<compile_context>
chip_gen: v6e
topology: v6e:2x2x1
jax: 0.10.0
libtpu: 0.0.40
codegen_flags: <defaults>
</compile_context>

<pallas_src>
import math

import jax
import jax.numpy as jnp
from jax.experimental import pallas as pl
from jax.experimental.pallas import tpu as pltpu


# --------------------------------------------------------------------------- #
# Kernel
# --------------------------------------------------------------------------- #
def _edges_kernel(v1_ref, v2_ref, w1_ref, w2_ref, b_ref, wg_ref, bg_ref,
                  flow_ref, strength_ref):
    # Two MXU pushes over the split K dim replace cat([v1, v2]) @ W_edge^T.
    acc = jnp.dot(v1_ref[...], w1_ref[...], preferred_element_type=jnp.float32)
    acc = acc + jnp.dot(v2_ref[...], w2_ref[...], preferred_element_type=jnp.float32)
    transformed = jnp.tanh(acc + b_ref[...].astype(jnp.float32))          # f32 EUP

    # Flow gate: VPU multiply + XLU lane reduction instead of an N=1 MXU matmul.
    logit = jnp.sum(transformed * wg_ref[...].astype(jnp.float32),
                    axis=-1, keepdims=True)                               # (tb, 1)
    strength = jax.nn.sigmoid(logit + bg_ref[...].astype(jnp.float32))

    flow_ref[...] = (transformed * strength).astype(flow_ref.dtype)
    # Exact-size (tb, 1) column store into the (E, B, 1) output -- no lane
    # padding, so strength HBM traffic is E*B elements, not E*B*128.
    strength_ref[...] = strength.astype(strength_ref.dtype)


# --------------------------------------------------------------------------- #
# VMEM sizing helpers
# --------------------------------------------------------------------------- #
def _vmem_capacity_bytes():
    try:
        info = pltpu.get_tpu_info()
        for name in ("vmem_capacity_bytes", "vmem_bytes", "vmem_size_bytes"):
            v = getattr(info, name, None)
            if v:
                return int(v)
    except Exception:
        pass
    return 64 * 1024 * 1024  # conservative default (v7x per-TC VMEM)


# --------------------------------------------------------------------------- #
# Wrappers
# --------------------------------------------------------------------------- #
def hypercube_edges_forward(v1_states, v2_states, stacked_params, *,
                            batch_tile=None, out_dtype=None):
    """Fused forward over E valid edges in a single pallas_call.

    v1_states, v2_states : (E, B, H)  (f32 or bf16 -- no casts happen here)
    stacked_params:
        w1, w2  : (E, H, H)  pre-transposed halves of W_edge
        b_edge  : (E, 1, H)
        w_gate  : (E, 1, H)  lane-aligned gate row
        b_gate  : (E, 1, 1)
    Returns {'flow': (E, B, H), 'strength': (E, B, 1)} in `out_dtype`
    (defaults to the activation dtype, so bf16 in -> bf16 out).
    """
    E, B, H = v1_states.shape
    if out_dtype is None:
        out_dtype = v1_states.dtype
    out_dtype = jnp.dtype(out_dtype)

    w1, w2 = stacked_params["w1"], stacked_params["w2"]
    b = stacked_params["b_edge"]
    wg = stacked_params["w_gate"]
    bg = stacked_params["b_gate"]

    act_itemsize = jnp.dtype(v1_states.dtype).itemsize
    w_itemsize = jnp.dtype(w1.dtype).itemsize
    out_itemsize = out_dtype.itemsize

    cap = _vmem_capacity_bytes()
    # Per-edge parameter bytes; the auto-pipeline double-buffers them.
    # TODO(synk): pipeline_mode=pl.Buffered(1) on the weight specs (they only
    # change with the slow `e` axis) would halve this; it is accounted for in
    # the tile sizing instead of relied upon here.
    weight_vmem = 2 * (2 * H * H + 2 * H + 1) * w_itemsize
    # Double-buffered activation inputs + flow/strength outputs, per batch row.
    per_row_vmem = 2 * (2 * H * act_itemsize + (H + 1) * out_itemsize)

    if batch_tile is None:
        budget = int(cap * 0.7)
        avail = budget - weight_vmem
        if avail <= per_row_vmem * 8:
            # Weights alone (nearly) exhaust VMEM at this H.
            # TODO(synk): add an output-N grid axis tiling w1/w2 (and the gate
            # reduction) for very large H instead of shrinking the batch tile.
            tb = 8
        else:
            tb = avail // per_row_vmem
        tb = min(tb, 2048)
        if tb >= B:
            tb = B
        elif tb >= 128:
            tb = (tb // 128) * 128
        else:
            tb = max(8, (tb // 8) * 8)
    else:
        tb = int(batch_tile)
    tb = max(1, min(tb, B))

    grid = (E, pl.cdiv(B, tb))

    act_spec = pl.BlockSpec((None, tb, H), lambda e, i: (e, i, 0))
    w_spec = pl.BlockSpec((None, H, H), lambda e, i: (e, 0, 0))
    row_spec = pl.BlockSpec((None, 1, H), lambda e, i: (e, 0, 0))
    sc_spec = pl.BlockSpec((None, 1, 1), lambda e, i: (e, 0, 0))

    operands = (v1_states, v2_states, w1, w2, b, wg, bg)
    bytes_accessed = sum(int(x.size) * jnp.dtype(x.dtype).itemsize
                         for x in operands)
    bytes_accessed += E * B * (H + 1) * out_itemsize        # flow + strength
    cost = pl.CostEstimate(
        flops=2 * E * B * (2 * H) * H + 6 * E * B * H,
        transcendentals=E * B * (H + 1),
        bytes_accessed=bytes_accessed,
    )

    footprint = weight_vmem + tb * per_row_vmem
    vmem_limit = int(min(cap * 0.9,
                         max(32 << 20, footprint * 1.25 + (4 << 20))))

    flow, strength = pl.pallas_call(
        _edges_kernel,
        out_shape=(
            jax.ShapeDtypeStruct((E, B, H), out_dtype),
            jax.ShapeDtypeStruct((E, B, 1), out_dtype),
        ),
        grid=grid,
        in_specs=[act_spec, act_spec, w_spec, w_spec, row_spec, row_spec, sc_spec],
        out_specs=(
            pl.BlockSpec((None, tb, H), lambda e, i: (e, i, 0)),
            pl.BlockSpec((None, tb, 1), lambda e, i: (e, i, 0)),
        ),
        compiler_params=pltpu.CompilerParams(
            dimension_semantics=("arbitrary", "parallel"),
            vmem_limit_bytes=vmem_limit),
        cost_estimate=cost,
    )(*operands)

    return {"flow": flow, "strength": strength}


def hypercube_edge_forward(v1_state, v2_state, params, **kw):
    """Single-edge convenience wrapper (fused kernel with E=1)."""
    stacked = jax.tree_util.tree_map(lambda x: x[None], params)
    out = hypercube_edges_forward(v1_state[None], v2_state[None], stacked, **kw)
    return {"flow": out["flow"][0], "strength": out["strength"][0]}


def invalid_edge_forward(v1_state):
    """hamming(v1, v2) != 1 branch of the PyTorch module: zeros, no kernel."""
    return {"flow": jnp.zeros_like(v1_state),
            "strength": jnp.zeros((v1_state.shape[0], 1), v1_state.dtype)}


# --------------------------------------------------------------------------- #
# Parameter init (nn.Linear defaults + edge-property scaling), stored
# pre-split / pre-transposed so the forward pass never transposes weights.
# `param_dtype` lets callers store bf16 weights ONCE at init (no per-call cast).
# --------------------------------------------------------------------------- #
def init_hypercube_edge_params(key, hidden_dim, vertex1, vertex2,
                               param_dtype=jnp.float32):
    hamming = bin(vertex1 ^ vertex2).count("1")
    assert hamming == 1, "only valid edges have parameters (invalid edges return zeros)"
    diff = vertex1 ^ vertex2
    dimension_index = (diff & -diff).bit_length() - 1
    dimensions = ["physical", "emotional", "mental", "intuitive", "spiritual"]
    transitioning = dimensions[dimension_index] if dimension_index < 5 else "unknown"
    dim_weights = {"physical": 1.0, "emotional": 0.8, "mental": 1.2,
                   "intuitive": 0.9, "spiritual": 1.5}
    mult = dim_weights.get(transitioning, 1.0)

    H = hidden_dim
    k1, k2, k3, k4 = jax.random.split(key, 4)
    bound_e = 1.0 / math.sqrt(2 * H)
    bound_g = 1.0 / math.sqrt(H)
    w_edge = jax.random.uniform(k1, (H, 2 * H), jnp.float32, -bound_e, bound_e) * mult
    b_edge = jax.random.uniform(k2, (H,), jnp.float32, -bound_e, bound_e)
    w_gate = jax.random.uniform(k3, (1, H), jnp.float32, -bound_g, bound_g) * mult
    b_gate = jax.random.uniform(k4, (1,), jnp.float32, -bound_g, bound_g)
    return {
        "w1": jnp.transpose(w_edge[:, :H]).astype(param_dtype),   # (H, H)
        "w2": jnp.transpose(w_edge[:, H:]).astype(param_dtype),   # (H, H)
        "b_edge": b_edge.reshape(1, H).astype(param_dtype),
        "w_gate": w_gate.astype(param_dtype),                     # (1, H) row
        "b_gate": b_gate.reshape(1, 1).astype(param_dtype),
    }


def stack_edge_params(param_list):
    """Stack per-edge param pytrees along a leading edge axis."""
    return jax.tree_util.tree_map(lambda *xs: jnp.stack(xs, axis=0), *param_list)


# --------------------------------------------------------------------------- #
# Demo / correctness check
# --------------------------------------------------------------------------- #
if __name__ == "__main__":
    B, H = 2, 32
    # All five hamming-distance-1 transitions from vertex 0 (one per dimension).
    edges = [(0, 1), (0, 2), (0, 4), (0, 8), (0, 16)]
    E = len(edges)

    key = jax.random.PRNGKey(0)
    kp, kv1, kv2 = jax.random.split(key, 3)
    param_keys = jax.random.split(kp, E)
    per_edge = [init_hypercube_edge_params(param_keys[i], H, *edges[i])
                for i in range(E)]
    params = stack_edge_params(per_edge)

    v1 = jax.random.normal(kv1, (E, B, H), jnp.float32)
    v2 = jax.random.normal(kv2, (E, B, H), jnp.float32)

    # Fused kernel over all edges (f32 path).
    out = jax.jit(hypercube_edges_forward)(v1, v2, params)
    jax.block_until_ready(out)

    # Pure-JAX reference reproducing the PyTorch concat/Linear formulation.
    w_full_t = jnp.concatenate([params["w1"], params["w2"]], axis=1)   # (E, 2H, H)
    combined = jnp.concatenate([v1, v2], axis=-1)                      # (E, B, 2H)
    t_ref = jnp.tanh(
        jnp.einsum("ebk,ekh->ebh", combined, w_full_t,
                   precision=jax.lax.Precision.HIGHEST) + params["b_edge"])
    s_ref = jax.nn.sigmoid(
        jnp.einsum("ebh,eh->eb", t_ref, params["w_gate"][:, 0, :],
                   precision=jax.lax.Precision.HIGHEST)[..., None]
        + params["b_gate"])
    f_ref = t_ref * s_ref

    assert out["flow"].shape == (E, B, H)
    assert out["strength"].shape == (E, B, 1)
    assert jnp.allclose(out["flow"], f_ref, atol=1e-4)
    assert jnp.allclose(out["strength"], s_ref, atol=1e-4)

    # Single-edge wrapper matches as well.
    one = hypercube_edge_forward(v1[0], v2[0], per_edge[0])
    jax.block_until_ready(one)
    assert jnp.allclose(one["flow"], f_ref[0], atol=1e-4)
    assert jnp.allclose(one["strength"], s_ref[0], atol=1e-4)

    # bf16 end-to-end path: params cast ONCE (as if stored bf16 at init) and
    # activations produced in bf16 upstream -- no per-call casts in the wrapper;
    # outputs come back in bf16 (half the flow writeback bytes).
    params_bf16 = jax.tree_util.tree_map(
        lambda x: x.astype(jnp.bfloat16), params)
    v1_bf16 = v1.astype(jnp.bfloat16)
    v2_bf16 = v2.astype(jnp.bfloat16)
    out_bf16 = hypercube_edges_forward(v1_bf16, v2_bf16, params_bf16)
    jax.block_until_ready(out_bf16)
    assert out_bf16["flow"].dtype == jnp.bfloat16
    assert jnp.allclose(out_bf16["flow"].astype(jnp.float32), f_ref, atol=5e-2)
    assert jnp.allclose(out_bf16["strength"].astype(jnp.float32), s_ref, atol=5e-2)

    # Invalid-edge branch (hamming != 1) needs no kernel: zeros, as in PyTorch.
    zero = invalid_edge_forward(v1[0])
    assert float(jnp.sum(jnp.abs(zero["flow"]))) == 0.0

    print("KERNEL_OK")
</pallas_src>

<mosaic_0001>
module attributes {stable_mosaic.version = 11 : i64} {
  func.func @_edges_kernel(%arg0: i32, %arg1: i32, %arg2: memref<1x2x32xf32, #tpu.memory_space<vmem>>, %arg3: memref<1x2x32xf32, #tpu.memory_space<vmem>>, %arg4: memref<1x32x32xf32, #tpu.memory_space<vmem>>, %arg5: memref<1x32x32xf32, #tpu.memory_space<vmem>>, %arg6: memref<1x1x32xf32, #tpu.memory_space<vmem>>, %arg7: memref<1x1x32xf32, #tpu.memory_space<vmem>>, %arg8: memref<1x1x1xf32, #tpu.memory_space<vmem>>, %arg9: memref<1x2x32xf32, #tpu.memory_space<vmem>>, %arg10: memref<1x2x1xf32, #tpu.memory_space<vmem>>) attributes {dimension_semantics = [#tpu.dimension_semantics<arbitrary>, #tpu.dimension_semantics<parallel>], iteration_bounds = array<i64: 5, 1>, scalar_prefetch = 0 : i64, scratch_operands = 0 : i64, tpu.core_type = #tpu.core_type<tc>, window_params = [{transform_indices = @transform_0, window_bounds = array<i64: 1, 2, 32>}, {transform_indices = @transform_1, window_bounds = array<i64: 1, 2, 32>}, {transform_indices = @transform_2, window_bounds = array<i64: 1, 32, 32>}, {transform_indices = @transform_3, window_bounds = array<i64: 1, 32, 32>}, {transform_indices = @transform_4, window_bounds = array<i64: 1, 1, 32>}, {transform_indices = @transform_5, window_bounds = array<i64: 1, 1, 32>}, {transform_indices = @transform_6, window_bounds = array<i64: 1, 1, 1>}, {transform_indices = @transform_7, window_bounds = array<i64: 1, 2, 32>}, {transform_indices = @transform_8, window_bounds = array<i64: 1, 2, 1>}]} {
    %c0 = arith.constant 0 : index
    %c0_0 = arith.constant 0 : index
    %c0_1 = arith.constant 0 : index
    %0 = vector.load %arg2[%c0, %c0_0, %c0_1] : memref<1x2x32xf32, #tpu.memory_space<vmem>>, vector<1x2x32xf32>
    %1 = vector.shape_cast %0 : vector<1x2x32xf32> to vector<2x32xf32>
    %c0_2 = arith.constant 0 : index
    %c0_3 = arith.constant 0 : index
    %c0_4 = arith.constant 0 : index
    %2 = vector.load %arg4[%c0_2, %c0_3, %c0_4] : memref<1x32x32xf32, #tpu.memory_space<vmem>>, vector<1x32x32xf32>
    %3 = vector.shape_cast %2 : vector<1x32x32xf32> to vector<32x32xf32>
    %cst = arith.constant dense<0.000000e+00> : vector<2x32xf32>
    %4 = tpu.matmul %1, %3, %cst {dimension_numbers = #tpu.dot_dimension_numbers<[1], [0], [0], [1], [0, 0, 1, 1], [], []>} : vector<2x32xf32>, vector<32x32xf32>, vector<2x32xf32> -> vector<2x32xf32>
    %c0_5 = arith.constant 0 : index
    %c0_6 = arith.constant 0 : index
    %c0_7 = arith.constant 0 : index
    %5 = vector.load %arg3[%c0_5, %c0_6, %c0_7] : memref<1x2x32xf32, #tpu.memory_space<vmem>>, vector<1x2x32xf32>
    %6 = vector.shape_cast %5 : vector<1x2x32xf32> to vector<2x32xf32>
    %c0_8 = arith.constant 0 : index
    %c0_9 = arith.constant 0 : index
    %c0_10 = arith.constant 0 : index
    %7 = vector.load %arg5[%c0_8, %c0_9, %c0_10] : memref<1x32x32xf32, #tpu.memory_space<vmem>>, vector<1x32x32xf32>
    %8 = vector.shape_cast %7 : vector<1x32x32xf32> to vector<32x32xf32>
    %cst_11 = arith.constant dense<0.000000e+00> : vector<2x32xf32>
    %9 = tpu.matmul %6, %8, %cst_11 {dimension_numbers = #tpu.dot_dimension_numbers<[1], [0], [0], [1], [0, 0, 1, 1], [], []>} : vector<2x32xf32>, vector<32x32xf32>, vector<2x32xf32> -> vector<2x32xf32>
    %10 = arith.addf %4, %9 : vector<2x32xf32>
    %c0_12 = arith.constant 0 : index
    %c0_13 = arith.constant 0 : index
    %c0_14 = arith.constant 0 : index
    %11 = vector.load %arg6[%c0_12, %c0_13, %c0_14] : memref<1x1x32xf32, #tpu.memory_space<vmem>>, vector<1x1x32xf32>
    %12 = vector.shape_cast %11 : vector<1x1x32xf32> to vector<1x32xf32>
    %13 = vector.broadcast %12 : vector<1x32xf32> to vector<2x32xf32>
    %14 = arith.addf %10, %13 : vector<2x32xf32>
    %15 = math.tanh %14 : vector<2x32xf32>
    %c0_15 = arith.constant 0 : index
    %c0_16 = arith.constant 0 : index
    %c0_17 = arith.constant 0 : index
    %16 = vector.load %arg7[%c0_15, %c0_16, %c0_17] : memref<1x1x32xf32, #tpu.memory_space<vmem>>, vector<1x1x32xf32>
    %17 = vector.shape_cast %16 : vector<1x1x32xf32> to vector<1x32xf32>
    %18 = vector.broadcast %17 : vector<1x32xf32> to vector<2x32xf32>
    %19 = arith.mulf %15, %18 : vector<2x32xf32>
    %cst_18 = arith.constant dense<0.000000e+00> : vector<2xf32>
    %20 = vector.multi_reduction <add>, %19, %cst_18 [1] : vector<2x32xf32> to vector<2xf32>
    %21 = vector.shape_cast %20 : vector<2xf32> to vector<2x1xf32>
    %c0_19 = arith.constant 0 : index
    %c0_20 = arith.constant 0 : index
    %c0_21 = arith.constant 0 : index
    %22 = vector.load %arg8[%c0_19, %c0_20, %c0_21] : memref<1x1x1xf32, #tpu.memory_space<vmem>>, vector<1x1x1xf32>
    %23 = vector.shape_cast %22 : vector<1x1x1xf32> to vector<1x1xf32>
    %24 = vector.broadcast %23 : vector<1x1xf32> to vector<2x1xf32>
    %25 = arith.addf %21, %24 : vector<2x1xf32>
    %26 = arith.negf %25 : vector<2x1xf32>
    %27 = math.exp %26 : vector<2x1xf32>
    %cst_22 = arith.constant 1.000000e+00 : f32
    %28 = vector.broadcast %cst_22 : f32 to vector<2x1xf32>
    %29 = arith.addf %28, %27 : vector<2x1xf32>
    %30 = arith.divf %28, %29 : vector<2x1xf32>
    %31 = vector.broadcast %30 : vector<2x1xf32> to vector<2x32xf32>
    %32 = arith.mulf %15, %31 : vector<2x32xf32>
    %c0_23 = arith.constant 0 : index
    %c0_24 = arith.constant 0 : index
    %c0_25 = arith.constant 0 : index
    %33 = vector.load %arg9[%c0_23, %c0_24, %c0_25] : memref<1x2x32xf32, #tpu.memory_space<vmem>>, vector<1x2x32xf32>
    %34 = vector.shape_cast %33 : vector<1x2x32xf32> to vector<2x32xf32>
    %35 = vector.shape_cast %32 : vector<2x32xf32> to vector<1x2x32xf32>
    tpu.vector_store %arg9[%c0_23, %c0_24, %c0_25], %35 {strides = array<i32>} : memref<1x2x32xf32, #tpu.memory_space<vmem>>, vector<1x2x32xf32>,
    %c0_26 = arith.constant 0 : index
    %c0_27 = arith.constant 0 : index
    %c0_28 = arith.constant 0 : index
    %36 = vector.load %arg10[%c0_26, %c0_27, %c0_28] : memref<1x2x1xf32, #tpu.memory_space<vmem>>, vector<1x2x1xf32>
    %37 = vector.shape_cast %36 : vector<1x2x1xf32> to vector<2x1xf32>
    %38 = vector.shape_cast %30 : vector<2x1xf32> to vector<1x2x1xf32>
    tpu.vector_store %arg10[%c0_26, %c0_27, %c0_28], %38 {strides = array<i32>} : memref<1x2x1xf32, #tpu.memory_space<vmem>>, vector<1x2x1xf32>,
    return
  }
  func.func @transform_0(%arg0: i32, %arg1: i32) -> (i32, i32, i32) {
    %c0_i32 = arith.constant 0 : i32
    %c0_i32_0 = arith.constant 0 : i32
    return %arg0, %arg1, %c0_i32 : i32, i32, i32
  }
  func.func @transform_1(%arg0: i32, %arg1: i32) -> (i32, i32, i32) {
    %c0_i32 = arith.constant 0 : i32
    %c0_i32_0 = arith.constant 0 : i32
    return %arg0, %arg1, %c0_i32 : i32, i32, i32
  }
  func.func @transform_2(%arg0: i32, %arg1: i32) -> (i32, i32, i32) {
    %c0_i32 = arith.constant 0 : i32
    %c0_i32_0 = arith.constant 0 : i32
    %c0_i32_1 = arith.constant 0 : i32
    return %arg0, %c0_i32, %c0_i32_0 : i32, i32, i32
  }
  func.func @transform_3(%arg0: i32, %arg1: i32) -> (i32, i32, i32) {
    %c0_i32 = arith.constant 0 : i32
    %c0_i32_0 = arith.constant 0 : i32
    %c0_i32_1 = arith.constant 0 : i32
    return %arg0, %c0_i32, %c0_i32_0 : i32, i32, i32
  }
  func.func @transform_4(%arg0: i32, %arg1: i32) -> (i32, i32, i32) {
    %c0_i32 = arith.constant 0 : i32
    %c0_i32_0 = arith.constant 0 : i32
    %c0_i32_1 = arith.constant 0 : i32
    return %arg0, %c0_i32, %c0_i32_0 : i32, i32, i32
  }
  func.func @transform_5(%arg0: i32, %arg1: i32) -> (i32, i32, i32) {
    %c0_i32 = arith.constant 0 : i32
    %c0_i32_0 = arith.constant 0 : i32
    %c0_i32_1 = arith.constant 0 : i32
    return %arg0, %c0_i32, %c0_i32_0 : i32, i32, i32
  }
  func.func @transform_6(%arg0: i32, %arg1: i32) -> (i32, i32, i32) {
    %c0_i32 = arith.constant 0 : i32
    %c0_i32_0 = arith.constant 0 : i32
    %c0_i32_1 = arith.constant 0 : i32
    return %arg0, %c0_i32, %c0_i32_0 : i32, i32, i32
  }
  func.func @transform_7(%arg0: i32, %arg1: i32) -> (i32, i32, i32) {
    %c0_i32 = arith.constant 0 : i32
    %c0_i32_0 = arith.constant 0 : i32
    return %arg0, %arg1, %c0_i32 : i32, i32, i32
  }
  func.func @transform_8(%arg0: i32, %arg1: i32) -> (i32, i32, i32) {
    %c0_i32 = arith.constant 0 : i32
    %c0_i32_0 = arith.constant 0 : i32
    return %arg0, %arg1, %c0_i32 : i32, i32, i32
  }
}

</mosaic_0001>

<bundles_post_ra>
// kernel: hypercube_edges_forward.1
= control target key start
LH: loop header
LB: loop body
LE: loop exit
PB: predicated region body
PF: predicated region fallthrough
CT: control target
= control target key end

     0   :  { %s1592_s0 = inlined_call_operand.hbm [shape: f32[5,2,32], index: 0, kind: input, shape index: {}]   ;;  %s1593_s1 = inlined_call_operand.hbm [shape: f32[5,2,32], index: 1, kind: input, shape index: {}]   ;;  %s1594_s2 = inlined_call_operand.hbm [shape: f32[5,32,32], index: 2, kind: input, shape index: {}]   ;;  %s1595_s3 = inlined_call_operand.hbm [shape: f32[5,32,32], index: 3, kind: input, shape index: {}]   ;;  %s1596_s4 = inlined_call_operand.vmem [shape: f32[5,1,32], index: 4, kind: input, shape index: {}]   ;;  %s1597_s5 = inlined_call_operand.vmem [shape: f32[5,1,32], index: 5, kind: input, shape index: {}]   ;;  %s1598_s6 = inlined_call_operand.vmem [shape: f32[5,1,1], index: 6, kind: input, shape index: {}]   ;;  %s1599_s7 = inlined_call_operand.hbm [shape: f32[5,2,32], index: 7, kind: output, shape index: {0}]   ;;  %s1600_s8 = inlined_call_operand.vmem [shape: f32[5,2,1], index: 8, kind: output, shape index: {1}]  }
   0x1   :  { %1608 = sst [smem:[#allocation21_spill]] %s1592_s0 }
   0x2   :  { %1609 = sst [smem:[#allocation22_spill]] %s1593_s1 }
   0x3   :  { %1610 = sst [smem:[#allocation23_spill]] %s1599_s7 }
   0x4   :  { %14 = vsyncpa [#allocation3], 0 }
   0x5   :  { %16 = vsyncpa [#allocation3 + $0x1], 0 }
   0x6   :  { %17 = vsyncpa [#allocation6], 0 }
   0x7   :  { %19 = vsyncpa [#allocation6 + $0x1], 0 }
   0x8   :  { %20 = vsyncpa [#allocation9], 0 }
   0x9   :  { %22 = vsyncpa [#allocation9 + $0x1], 0 }
   0xa   :  { %23 = vsyncpa [#allocation4], 0 }
   0xb   :  { %25 = vsyncpa [#allocation4 + $0x1], 0  ;;  %s1358_s27 = smov 0   ;;  %s1360_s28 = smov 0  }
   0xc   :  { %s1362_s29 = smov 0   ;;  %s1364_s30 = smov 0  }
   0xd   :  { %s1366_s9 = smov 0   ;;  %s1368_s10 = smov 0  }
   0xe LB: > { %1611 = sst [smem:[#allocation15_spill]] %s1281_s27  ;;  %s1389_s11 = sadd.s32 4294967295, %s1301_s10   ;;  %s1301_s10 = sphi %s1368_s10, %s31_s10   ;;  %s1297_s9 = sphi %s1366_s9, %s1636_s9   ;;  %s1293_s30 = sphi %s1364_s30, %s1635_s30   ;;  %s1289_s29 = sphi %s1362_s29, %s1631_s29   ;;  %s1285_s28 = sphi %s1360_s28, %s1634_s28   ;;  %s1281_s27 = sphi %s1358_s27, %s1633_s27  }
   0xf   : > { %1612 = sst [smem:[#allocation16_spill]] %s1289_s29  ;;  %s948_s12 = sadd.s32 4294967294, %s1301_s10  }
  0x10   : > { %1613 = sst [smem:[#allocation17_spill]] %s1301_s10  ;;  %s43_s13 = sadd.s32 1, %s1297_s9 }
  0x11   : > { %s52_s14 = sadd.s32 1, %s1289_s29  ;;  %p45_p0 = scmp.ge.s32.totalorder %s43_s13, 5 }
  0x12   : > { %p59_p1 = scmp.ne.s32.totalorder %s1289_s29, %s1285_s28  ;;  %p60_p2 = scmp.eq.s32.totalorder %s1301_s10, 0 }
  0x13   : > { %p65_p3 = scmp.ne.s32.totalorder %s1285_s28, %s1281_s27  ;;  %s1638_s13 = smov (%p45_p0, %s43_s13), 0 }
  0x14   : > { %1614 = sst [smem:[#allocation18_spill]] %s1638_s13  ;;  %p1401_p4 = por %p60_p2, %p59_p1 }
  0x15   : > { %p66_p5 = scmp.eq.s32.totalorder %s1389_s11, 0  ;;  %s47_s16 = ssub.s32 %s1297_s9, %s1638_s13 }
  0x16   : > { %p249_p6 = scmp.eq.s32.totalorder %s1389_s11, 4  ;;  %p50_p7 = scmp.eq.s32.totalorder %s47_s16, 0 }
  0x17   : > { %p1409_p8 = por %p66_p5, %p65_p3  ;;  %p255_p10 = scmp.eq.s32.totalorder %s948_s12, 4 }
  0x18   : > { %p1413_p9 = por %p249_p6, %p59_p1  ;;  %p1039_p12 = scmp.lt.s32.totalorder %s1301_s10, 5 }
  0x19   : > { %s1418_s19 = scalar_select %p50_p7, %s1289_s29, %s52_s14  }
  0x1a   : > { %p1420_p11 = por %p255_p10, %p65_p3  ;;  %s1426_s21 = sand.u32 1, %s1289_s29  }
  0x1b   : > { %1618 = sst [smem:[#allocation19_spill]] %s1418_s19  ;;  %s951_s22 = sshll.u32 %s1426_s21, 1 }
  0x1c   : > { %s1619_s20 = scalar_select %p1420_p11, 1, 0 }
  0x1d   : > { %s952_s23 = sshll.u32 %s1297_s9, 5  ;;  %p1432_p13 = pnand %p1039_p12, %p1401_p4 }
  0x1e   : > { %1620 = sst [smem:[#allocation20_spill]] %s1619_s20  ;;  %s322_s25 = sand.u32 1, %s1301_s10  }
  0x1f   : > { %s1622_s1 = sld [smem:[#allocation22_spill]]  ;;  %s326_s16 = scalar_lea.vmem [#allocation5], %s951_s22 }
  0x20   : > { %s334_s13 = sshll.u32 %s326_s16, 4  ;;  %s978_s29 = sshll.u32 %s1297_s9, 9  ;;  %s335_s13 = int_to_ptr.vmem [resolvable:$true] %s334_s13 }
  0x21   : > { %s1444_s20 = scalar_lea.sflag [#allocation6], %s322_s25  ;;  %p1103_p0 = pneg %p1432_p13 }
  0x22   : > { %s1114_s15 = scalar_lea.vmem %s335_s13, 32  ;;  %s1303_s27 = smov [#allocation5]  }
  0x23   : > { %p1115_p1 = scmp.ne.s32.totalorder %s335_s13, %s1114_s15  ;;  %s1119_s7 = sshll.u32 %s1303_s27, 4  ;;  %s1120_s7 = int_to_ptr.vmem [resolvable:$false] %s1119_s7 }
  0x24   : > { %s1121_s26 = scalar_lea.vmem %s1120_s7, 64  ;;  %p1122_p4 = scmp.lt.s32.totalorder %s335_s13, %s1120_s7 }
  0x25   : > { %s332_s14 = scalar_lea.hbm %s1622_s1, %s952_s23  ;;  %p1117_p2 = pnand %p1115_p1, %p1103_p0 }
  0x26   : > { %p1123_p5 = scmp.lt.s32.totalorder %s1121_s26, %s1114_s15 }
  0x27   : > { %p1118_p3 = pneg %p1117_p2 }
  0x28   : > { %p1124_p6 = por %p1123_p5, %p1122_p4 }
  0x2a   : > { %p1125_p7 = pnand %p1124_p6, %p1118_p3 }
  0x2c   : > { %1128 = shalt.err (!%p1125_p7)
}
  0x2d   : > { %1028 = dma.hbm_to_vmem [thread:$0]  (!%p1432_p13), %s332_s14, 32, %s335_s13, %s1444_s20  }
  0x2e   : > { %p961_p10 = scmp.ge.s32.totalorder %s1301_s10, 1  ;;  %p399_p12 = scmp.lt.s32.totalorder %s1301_s10, 6 }
  0x2f   : > { %s1624_s0 = sld [smem:[#allocation21_spill]]  ;;  %s307_s16 = scalar_lea.vmem [#allocation2], %s951_s22 }
  0x30   : > { %p1456_p1 = pnand %p961_p10, %p399_p12  ;;  %s315_s15 = sshll.u32 %s307_s16, 4  ;;  %s316_s15 = int_to_ptr.vmem [resolvable:$true] %s315_s15 }
  0x31   : > { %s1470_s1 = scalar_lea.hbm %s1594_s2, %s978_s29  ;;  %s304_s13 = scalar_lea.sflag [#allocation3], %s1426_s21 }
  0x32   : > { %s1142_s14 = scalar_lea.vmem %s316_s15, 32  ;;  %s1304_s10 = smov [#allocation2]  }
  0x33   : > { %p1143_p2 = scmp.ne.s32.totalorder %s316_s15, %s1142_s14  ;;  %s1147_s7 = sshll.u32 %s1304_s10, 4  ;;  %s1148_s7 = int_to_ptr.vmem [resolvable:$false] %s1147_s7 }
  0x34   : > { %p1150_p5 = scmp.lt.s32.totalorder %s316_s15, %s1148_s7 }
  0x35   : > { %s313_s12 = scalar_lea.hbm %s1624_s0, %s952_s23  ;;  %p1145_p3 = pnand %p1143_p2, %p1103_p0 }
  0x36   : > { %s1149_s23 = scalar_lea.vmem %s1148_s7, 64 }
  0x37   : > { %p1146_p4 = pneg %p1145_p3  ;;  %p1151_p6 = scmp.lt.s32.totalorder %s1149_s23, %s1142_s14 }
  0x39   : > { %p1152_p7 = por %p1151_p6, %p1150_p5 }
  0x3b   : > { %p1153_p10 = pnand %p1152_p7, %p1146_p4 }
  0x3d   : > { %1156 = shalt.err (!%p1153_p10)
}
  0x3e   : > { %1025 = dma.hbm_to_vmem [thread:$0]  (!%p1432_p13), %s313_s12, 32, %s316_s15, %s304_s13  }
  0x3f   : > { %s1625_s19 = sshll.u32 %s1426_s21, 5  ;;  %s1305_s10 = smov [#allocation7]  }
  0x40   : > { %s345_s22 = scalar_lea.vmem [#allocation7], %s1625_s19  ;;  %s1175_s26 = sshll.u32 %s1305_s10, 4  ;;  %s1176_s26 = int_to_ptr.vmem [resolvable:$false] %s1175_s26 }
  0x41   : > { %s352_s25 = sshll.u32 %s345_s22, 4  ;;  %s1177_s14 = scalar_lea.vmem %s1176_s26, 1024  ;;  %s353_s25 = int_to_ptr.vmem [resolvable:$true] %s352_s25 }
  0x42   : > { %s1170_s16 = scalar_lea.vmem %s353_s25, 512  ;;  %p1178_p4 = scmp.lt.s32.totalorder %s353_s25, %s1176_s26 }
  0x43   : > { %p1171_p12 = scmp.ne.s32.totalorder %s353_s25, %s1170_s16  ;;  %p1179_p5 = scmp.lt.s32.totalorder %s1177_s14, %s1170_s16 }
  0x45   : > { %p1173_p2 = pnand %p1171_p12, %p1103_p0  ;;  %p1180_p6 = por %p1179_p5, %p1178_p4 }
  0x47   : > { %p1174_p3 = pneg %p1173_p2 }
  0x49   : > { %p1181_p7 = pnand %p1180_p6, %p1174_p3 }
  0x4b   : > { %1184 = shalt.err (!%p1181_p7)
}
  0x4c   : > { %s1306_s12 = smov 128   ;;  %s1307_s15 = smov 8  }
  0x4d   : > { %1031 = dma.hbm_to_vmem [thread:$0]  (!%p1432_p13), %s1470_s1, 512, %s353_s25, %s1444_s20, %s1306_s12, %s1306_s12, %s1307_s15  }
  0x4e   : > { %s372_s23 = scalar_lea.hbm %s1595_s3, %s978_s29  ;;  %s366_s22 = scalar_lea.vmem [#allocation8], %s1625_s19 }
  0x4f   : > { %s373_s16 = sshll.u32 %s366_s22, 4  ;;  %s363_s10 = scalar_lea.sflag [#allocation9], %s1426_s21  ;;  %s374_s16 = int_to_ptr.vmem [resolvable:$true] %s373_s16 }
  0x50   : > { %s1198_s26 = scalar_lea.vmem %s374_s16, 512  ;;  %s1308_s14 = smov [#allocation8]  }
  0x51   : > { %p1199_p10 = scmp.ne.s32.totalorder %s374_s16, %s1198_s26  ;;  %s1203_s0 = sshll.u32 %s1308_s14, 4  ;;  %s1204_s0 = int_to_ptr.vmem [resolvable:$false] %s1203_s0 }
  0x52   : > { %s1205_s1 = scalar_lea.vmem %s1204_s0, 1024  ;;  %p1206_p3 = scmp.lt.s32.totalorder %s374_s16, %s1204_s0 }
  0x53   : > { %p1201_p12 = pnand %p1199_p10, %p1103_p0  ;;  %p1207_p4 = scmp.lt.s32.totalorder %s1205_s1, %s1198_s26 }
  0x55   : > { %p1202_p2 = pneg %p1201_p12  ;;  %p1208_p5 = por %p1207_p4, %p1206_p3 }
  0x57   : > { %p1209_p6 = pnand %p1208_p5, %p1202_p2 }
  0x59   : > { %1212 = shalt.err (!%p1209_p6)
}
  0x5a   : > { %1034 = dma.hbm_to_vmem [thread:$0]  (!%p1432_p13), %s372_s23, 512, %s374_s16, %s363_s10, %s1306_s12, %s1306_s12, %s1307_s15  }
  0x5b   : > { %403 = sbr.rel (%p1456_p1) target bundleno = 638 (0x27e), region = 48  ;;  %s1503_s29 = sand.u32 (!%p1456_p1), 1, %s1285_s28  }
  0x5c   : > { %s1506_s20 = sshll.u32 (!%p1456_p1), %s1503_s29, 1  ;;  %s406_s0 = scalar_lea.sflag (!%p1456_p1), [#allocation3], %s1503_s29 }
  0x5d   : > { %s409_s21 = scalar_lea.vmem (!%p1456_p1), [#allocation2], %s1506_s20 }
  0x60   : > { %1264 = dma.done.wait (%p1409_p8), %s406_s0, 32  }
  0x61   : > { %1266 = vsyncadd (%p1409_p8), %s406_s0, 4294967264  ;;  %s414_s24 = sand.u32 1, %s1389_s11   ;;  %s418_s25 = scalar_lea.vmem [#allocation5], %s1506_s20 }
  0x62   : > { %s415_s27 = scalar_lea.sflag [#allocation6], %s414_s24 }
  0x63   : > { %1268 = dma.done.wait (%p1409_p8), %s415_s27, 544  }
  0x64   : > { %1270 = vsyncadd (%p1409_p8), %s415_s27, 4294966752  ;;  %s964_s12 = sshll.u32 %s1503_s29, 5  ;;  %s433_s13 = scalar_lea.sflag [#allocation9], %s1503_s29 }
  0x65   : > { %s427_s15 = scalar_lea.vmem [#allocation7], %s964_s12  ;;  %s436_s7 = scalar_lea.vmem [#allocation8], %s964_s12 }
  0x66   : > { %1272 = dma.done.wait (%p1409_p8), %s433_s13, 512  }
  0x67   : > { %1274 = vsyncadd (%p1409_p8), %s433_s13, 4294966784  ;;  %v1309_v0 = vmov 0.0   ;;  %vm1310_vm0 = vmmov 0   ;;  %v525_v1 = vld [vmem:[%s436_s7 + $0x18] sm:$0xff]  ;;  %v524_v3 = vld [vmem:[%s436_s7 + $0x10] sm:$0xff]  ;;  %vm526_vm1 = vcmask 261120  }
  0x68   : > { %990 = vmatprep.subr.mxu0 %v1309_v0  ;;  %1001 = vmatprep.subr.mxu1 %v1309_v0  ;;  %v520_v2 = vld [vmem:[%s427_s15 + $0x18] sm:$0xff]  ;;  %v519_v4 = vld [vmem:[%s427_s15 + $0x10] sm:$0xff]  ;;  %v523_v5 = vld [vmem:[%s436_s7 + $0x8] sm:$0xff]  ;;  %p500_p8 = scmp.lt.s32.totalorder %s1293_s30, 4  ;;  %vm690_vm2 = vcmask 254976   ;;  %v1311_v22 = vmov 0  }
  0x69   : > { %998 = vmatprep.mubr.msk.f32.mxu0 %vm1310_vm0, %v1309_v0  ;;  %1009 = vmatprep.mubr.msk.f32.mxu1 %vm1310_vm0, %v1309_v0  ;;  %v518_v6 = vld [vmem:[%s427_s15 + $0x8] sm:$0xff]  ;;  %v522_v7 = vld [vmem:[%s436_s7] sm:$0xff]  ;;  %v521_v9 = vld [vmem:[%s418_s25] sm:$0x3]  ;;  %vm715_vm3 = vcmask 1024   ;;  %s975_s25 = sshll.u32 %s1293_s30, 5 }
  0x6a   : > { %991 = vmatpush3.msra.mxu0 %v525_v1  ;;  %1002 = vmatpush3.msra.mxu1 %v520_v2  ;;  %v517_v8 = vld [vmem:[%s427_s15] sm:$0xff]  ;;  %v516_v10 = vld [vmem:[%s409_s21] sm:$0x3]  ;;  %s1532_s11 = scalar_select %p500_p8, %s1293_s30, 4 }
  0x6b   : > { %992 = vmatprep.subr.mxu0 %v1309_v0  ;;  %1003 = vmatprep.subr.mxu1 %v1309_v0  ;;  %s490_s12 = scalar_lea.vmem [#allocation10], %s1506_s20  ;;  %s1626_s17 = sld [smem:[#allocation23_spill]] }
  0x6c   : > { %993 = vmatpush3.msra.mxu0 %v524_v3  ;;  %1004 = vmatpush3.msra.mxu1 %v519_v4  ;;  %s502_s19 = scalar_lea.vmem %s1596_s4, %s1532_s11  ;;  %s505_s10 = scalar_lea.vmem %s1597_s5, %s1532_s11 }
  0x6d   : > { %994 = vmatprep.subr.mxu0 %v1309_v0  ;;  %1005 = vmatprep.subr.mxu1 %v1309_v0  ;;  %v970_v13 = vld [vmem:[%s502_s19] ss:$0 sm:$0xff]  ;;  %s508_s1 = scalar_lea.vmem %s1598_s6, %s1532_s11  ;;  %s967_s0 = sshll.u32 %s1532_s11, 1 }
  0x6e   : > { %995 = vmatpush3.msra.mxu0 %v523_v5  ;;  %1006 = vmatpush3.msra.mxu1 %v518_v6  ;;  %v971_v18 = vld [vmem:[%s505_s10] ss:$0 sm:$0xff]  ;;  %s515_s27 = scalar_lea.vmem %s1600_s8, %s967_s0  ;;  %s739_s15 = sshll.u32 %s490_s12, 4  ;;  %s740_s15 = int_to_ptr.vmem [resolvable:$true] %s739_s15 }
  0x6f   : > { %996 = vmatprep.subr.mxu0 %v1309_v0  ;;  %1007 = vmatprep.subr.mxu1 %v1309_v0  ;;  %v972_v23 = vld [vmem:[%s508_s1] ss:$0 sm:$0xff]  ;;  %s718_s11 = scalar_lea.sflag [#allocation4], %s1503_s29  ;;  %s1213_s19 = scalar_lea.vmem %s740_s15, 32 }
  0x70   : > { %997 = vmatpush3.msra.mxu0 %v522_v7  ;;  %1008 = vmatpush3.msra.mxu1 %v517_v8  ;;  %p1214_p13 = scmp.ne.s32.totalorder %s740_s15, %s1213_s19  ;;  %s1312_s22 = smov [#allocation10]  }
  0x71   : > { %999 = vmatmul.mubr.msk.f32.vlgmr.msra.gmra.mxu0 %vm526_vm1, %v521_v9  ;;  %1010 = vmatmul.mubr.msk.f32.vlgmr.msra.gmra.mxu1 %vm526_vm1, %v516_v10  ;;  %s737_s23 = scalar_lea.hbm %s1626_s17, %s975_s25  ;;  %s1217_s16 = sshll.u32 %s1312_s22, 4  ;;  %s1218_s16 = int_to_ptr.vmem [resolvable:$false] %s1217_s16 }
  0x72   : > { %1094 = vset.pattern.permute.xlu0 %v1311_v22  ;;  %p1215_p0 = pnand %p1214_p13, %p1413_p9  ;;  %s1219_s30 = scalar_lea.vmem %s1218_s16, 64 }
  0x73   : > { %p1220_p7 = scmp.lt.s32.totalorder %s740_s15, %s1218_s16  ;;  %p1221_p10 = scmp.lt.s32.totalorder %s1219_s30, %s1213_s19 }
  0x74   : > { %p1216_p1 = pneg %p1215_p0 }
  0x75   : > { %p1222_p12 = por %p1221_p10, %p1220_p7 }
  0x77   : > { %p1223_p2 = pnand %p1222_p12, %p1216_p1 }
 0x131   : > { %v596_v11 = vpop.f32.mrf.mxu0  ;;  %v669_v12 = vpop.f32.mrf.mxu1 }
 0x132   : > { %v670_v14 = vadd.f32 %v669_v12, %v596_v11 }
 0x133   : > { %v1000_v15 = vpop.f32.mrf.mxu0  ;;  %v1011_v16 = vpop.f32.mrf.mxu1 }
 0x134   : > { %v680_v17 = vadd.f32 %v970_v13, %v670_v14 }
 0x136   : > { %1095 = vtanh.f32 %v680_v17 }
 0x143   : > { %v1096_v19 = vpop.eup %1095 }
 0x144   : > { %v689_v20 = vmul.f32 %v1096_v19, %v971_v18 }
 0x146   : > { %v691_v21 = vsel %vm690_vm2, %v689_v20, 0.0 }
 0x147   : > { %692 = vadd.xlane.f32.xlu0 %v691_v21 }
 0x1d0   : > { %v693_v24 = vpop.xlane.xlu0 %692 }
 0x1d1   : > { %v701_v25 = vadd.f32 %v972_v23, %v693_v24 }
 0x1d3   : > { %v973_v26 = vmul.f32 -1.442695, %v701_v25 }
 0x1d5   : > { %1097 = vpow2.f32 %v973_v26 }
 0x1e2   : > { %v1098_v27 = vpop.eup %1097 }
 0x1e3   : > { %v705_v28 = vadd.f32 1.0, %v1098_v27 }
 0x1e5   : > { %1099 = vrcp.f32 %v705_v28 }
 0x1f2   : > { %v1100_v29 = vpop.eup %1099 }
 0x1f3   : > { %716 = vst.msk [vmem:[%s515_s27] sm:$0x3] %vm715_vm3, %v1100_v29  ;;  %710 = vperm.xlu0 %1094, %v1100_v29  }
 0x26e   : > { %v711_v30 = vpop.permute.xlu0 %710 }
 0x26f   : > { %v713_v31 = vmul.f32 %v1096_v19, %v711_v30 }
 0x271   : > { %714 = vst.msk [vmem:[%s490_s12] sm:$0x3] %vm690_vm2, %v713_v31 }
 0x272   : > { %1226 = shalt.err (!%p1223_p2)
}
 0x273   : > { %s1227_s20 = scalar_lea.hbm %s737_s23, 32  ;;  %s1231_s26 = scalar_lea.hbm %s1626_s17, 160 }
 0x274   : > { %p1228_p3 = scmp.ne.s32.totalorder %s737_s23, %s1227_s20  ;;  %p1232_p6 = scmp.lt.s32.totalorder %s737_s23, %s1626_s17 }
 0x275   : > { %p1233_p8 = scmp.lt.s32.totalorder %s1231_s26, %s1227_s20 }
 0x276   : > { %p1229_p4 = pnand %p1228_p3, %p1413_p9 }
 0x277   : > { %p1234_p13 = por %p1233_p8, %p1232_p6 }
 0x278   : > { %p1230_p5 = pneg %p1229_p4 }
 0x27a   : > { %p1235_p0 = pnand %p1234_p13, %p1230_p5 }
 0x27c   : > { %1238 = shalt.err (!%p1235_p0)
}
 0x27d   : > { %1020 = dma.vmem_to_hbm [thread:$0]  (%p1413_p9), %s740_s15, 32, %s737_s23, %s718_s11  }
 0x27e PF: > { %s1627_s0 = sld [smem:[#allocation17_spill]] }
 0x27f   : > { %s1628_s21 = sld [smem:[#allocation15_spill]] }
 0x284   : > { %p1040_p1 = scmp.ge.s32.totalorder %s1627_s0, 2 }
 0x285   : > { %s754_s27 = sand.u32 1, %s1628_s21  }
 0x286   : > { %p1036_p7 = pnand %p1040_p1, %p1420_p11  ;;  %s755_s25 = scalar_lea.sflag [#allocation4], %s754_s27 }
 0x288   : > { %p1037_p10 = pneg %p1036_p7 }
 0x28a   : > { %1276 = dma.done.wait (%p1037_p10), %s755_s25, 32  }
 0x28b   : > { %1278 = vsyncadd (%p1037_p10), %s755_s25, 4294967264  ;;  %s31_s10 = sadd.s32 1, %s1627_s0   ;;  %s1630_s12 = sld [smem:[#allocation16_spill]] }
 0x28c   : > { %p28_p12 = scmp.ge.s32.totalorder %s31_s10, 7   ;;  %s1631_s29 = sld [smem:[#allocation19_spill]] }
 0x28d   : > { %s1632_s18 = sld [smem:[#allocation18_spill]]  ;;  %s1633_s27 = smov %s1285_s28 }
 0x28e   : > { %s1635_s30 = smov %s1297_s9 }
 0x28f   :  { %30 = sbr.rel (!%p28_p12) target bundleno = 14 (0xe), region = 151 }
 0x291   : > { %s1634_s28 = smov %s1630_s12 }
 0x293   : > { %s1636_s9 = smov %s1632_s18 }
 0x294   :  { %770 = vsyncpa [#allocation3], 1 }
 0x295   :  { %772 = vsyncpa [#allocation3 + $0x1], 1 }
 0x296   :  { %773 = vsyncpa [#allocation6], 1 }
 0x297   :  { %775 = vsyncpa [#allocation6 + $0x1], 1 }
 0x298   :  { %776 = vsyncpa [#allocation9], 1 }
 0x299   :  { %778 = vsyncpa [#allocation9 + $0x1], 1 }
 0x29a   :  { %779 = vsyncpa [#allocation4], 1 }
 0x29b   :  { %781 = vsyncpa [#allocation4 + $0x1], 1 }

</bundles_post_ra>
